<compile_context>
chip_gen: v6e
topology: v6e:2x2x1
jax: 0.10.0
libtpu: 0.0.40
codegen_flags: <defaults>
</compile_context>

<pallas_src>
import math

import jax
import jax.numpy as jnp
from jax.experimental import pallas as pl
from jax.experimental.pallas import tpu as pltpu


def _round_up(x, m):
    return ((x + m - 1) // m) * m


def _pad_to(x, shape):
    pads = [(0, s - d) for d, s in zip(x.shape, shape)]
    return jnp.pad(x, pads)


# ----------------------------- Pallas kernel --------------------------------
def _critic_kernel(state_ref, action_ref,
                   w1_ref, b1_ref,
                   w2s_ref, w2a_ref, b2_ref,
                   w3_ref, b3_ref,
                   out_ref):
    # fcs1 + ReLU (f32 MXU accumulation, f32 bias/ReLU epilogue).
    xs = jnp.dot(state_ref[...], w1_ref[...], preferred_element_type=jnp.float32)
    xs = jnp.maximum(xs + b1_ref[...], 0.0)

    # fcs2 on concat([xs, action]) -- folded as two matmuls (action kept at its
    # real K=action_size, no zero-padded MXU pass) -- + ReLU.
    h = jnp.dot(xs.astype(w2s_ref.dtype), w2s_ref[...],
                preferred_element_type=jnp.float32)
    h = h + jnp.dot(action_ref[...], w2a_ref[...],
                    preferred_element_type=jnp.float32)
    h = jnp.maximum(h + b2_ref[...], 0.0)

    # fcs3 (no activation); narrow (agent_count-wide) output block -> tiny writeback.
    out = jnp.dot(h.astype(w3_ref.dtype), w3_ref[...],
                  preferred_element_type=jnp.float32)
    out_ref[...] = (out + b3_ref[...]).astype(out_ref.dtype)


# ------------------------- one-time parameter prep ---------------------------
def prepare_critic_params(params, *, compute_dtype=jnp.bfloat16):
    """Transpose/pad/cast weights once; reuse the result across forward calls."""
    w1, b1, w2, b2, w3, b3 = (params[k] for k in ("w1", "b1", "w2", "b2", "w3", "b3"))

    fcs1_units, state_size = w1.shape
    fcs2_units = w2.shape[0]
    agent_count = w3.shape[0]
    action_size = w2.shape[1] - fcs1_units

    # Lane-dense hidden widths (exact: padded rows/cols are zero, ReLU(0)=0).
    H1 = _round_up(fcs1_units, 128)      # 250 -> 256
    H2 = _round_up(fcs2_units, 128)      # 175 -> 256

    return {
        # weights pre-transposed to (in, out); W2 split into hidden/action parts
        "w1_t": _pad_to(w1.T, (state_size, H1)).astype(compute_dtype),
        "w2s_t": _pad_to(w2[:, :fcs1_units].T, (H1, H2)).astype(compute_dtype),
        "w2a_t": _pad_to(w2[:, fcs1_units:].T, (action_size, H2)).astype(compute_dtype),
        "w3_t": _pad_to(w3.T, (H2, agent_count)).astype(compute_dtype),
        # biases stay f32 (added on the f32 accumulator)
        "b1": _pad_to(b1.reshape(1, -1), (1, H1)).astype(jnp.float32),
        "b2": _pad_to(b2.reshape(1, -1), (1, H2)).astype(jnp.float32),
        "b3": b3.reshape(1, -1).astype(jnp.float32),
        "dims": (state_size, action_size, agent_count, H1, H2),
        "compute_dtype": compute_dtype,
    }


# ------------------------------- wrapper -------------------------------------
def critic_forward(state, action, prep, *, block_batch=1024):
    """state: (B, state_size), action: (B, action_size) -> (B, agent_count) f32."""
    state_size, action_size, agent_count, H1, H2 = prep["dims"]
    cdt = prep["compute_dtype"]
    B = state.shape[0]

    # Batch tiling: rows per step multiple of 8; aim for >=8 grid steps when B
    # allows it (megacore sharding on v7x + pipeline depth), capped by block_batch.
    TB = min(block_batch, max(8, _round_up(-(-B // 8), 8)), _round_up(B, 8))
    grid = (pl.cdiv(B, TB),)   # partial last block handled by Pallas masking

    state_c = state.astype(cdt)
    action_c = action.astype(cdt)

    out = pl.pallas_call(
        _critic_kernel,
        out_shape=jax.ShapeDtypeStruct((B, agent_count), jnp.float32),
        grid_spec=pltpu.PrefetchScalarGridSpec(
            num_scalar_prefetch=0,
            grid=grid,
            in_specs=[
                # batch-tiled activations (last dims == full array dims -> legal)
                pl.BlockSpec((TB, state_size), lambda i: (i, 0)),
                pl.BlockSpec((TB, action_size), lambda i: (i, 0)),
                # VMEM-resident weights / biases (constant index_map -> DMA'd once)
                pl.BlockSpec((state_size, H1), lambda i: (0, 0)),
                pl.BlockSpec((1, H1), lambda i: (0, 0)),
                pl.BlockSpec((H1, H2), lambda i: (0, 0)),
                pl.BlockSpec((action_size, H2), lambda i: (0, 0)),
                pl.BlockSpec((1, H2), lambda i: (0, 0)),
                pl.BlockSpec((H2, agent_count), lambda i: (0, 0)),
                pl.BlockSpec((1, agent_count), lambda i: (0, 0)),
            ],
            out_specs=pl.BlockSpec((TB, agent_count), lambda i: (i, 0)),
        ),
        compiler_params=pltpu.CompilerParams(
            dimension_semantics=("parallel",),   # megacore sharding on v7x
        ),
    )(state_c, action_c, prep["w1_t"], prep["b1"], prep["w2s_t"],
      prep["w2a_t"], prep["b2"], prep["w3_t"], prep["b3"])

    return out


# ------------------------- deterministic param init -------------------------
def init_critic_params(key, state_size, action_size, agent_count,
                       fcs1_units=250, fcs2_units=175):
    """Mirrors Critic.__init__ / reset_parameters shapes & init ranges."""
    ks = jax.random.split(key, 6)

    def uniform(k, shape, lim):
        return jax.random.uniform(k, shape, jnp.float32, -lim, lim)

    # hidden_init uses weight.size()[0] == out_features
    w1 = uniform(ks[0], (fcs1_units, state_size), 1.0 / math.sqrt(fcs1_units))
    b1 = uniform(ks[1], (fcs1_units,), 1.0 / math.sqrt(state_size))          # torch default bias init
    w2 = uniform(ks[2], (fcs2_units, fcs1_units + action_size), 1.0 / math.sqrt(fcs2_units))
    b2 = uniform(ks[3], (fcs2_units,), 1.0 / math.sqrt(fcs1_units + action_size))
    w3 = uniform(ks[4], (agent_count, fcs2_units), 0.003)
    b3 = uniform(ks[5], (agent_count,), 1.0 / math.sqrt(fcs2_units))
    return {"w1": w1, "b1": b1, "w2": w2, "b2": b2, "w3": w3, "b3": b3}


# ---------------------------- pure-JAX reference -----------------------------
def critic_ref(state, action, p):
    xs = jnp.maximum(state @ p["w1"].T + p["b1"], 0.0)
    x = jnp.concatenate([xs, action], axis=1)
    h = jnp.maximum(x @ p["w2"].T + p["b2"], 0.0)
    return h @ p["w3"].T + p["b3"]


if __name__ == "__main__":
    batch = 8
    state_size = 32
    action_size = 4
    agent_count = 2

    key = jax.random.PRNGKey(0)
    k_params, k_state, k_action = jax.random.split(key, 3)

    params = init_critic_params(k_params, state_size, action_size, agent_count)
    state = jax.random.normal(k_state, (batch, state_size), jnp.float32)
    action = jax.random.normal(k_action, (batch, action_size), jnp.float32)

    ref = critic_ref(state, action, params)

    # f32 compute path: tolerance-level agreement with the module semantics.
    prep_f32 = prepare_critic_params(params, compute_dtype=jnp.float32)
    out_f32 = jax.block_until_ready(critic_forward(state, action, prep_f32))
    assert out_f32.shape == (batch, agent_count)
    assert jnp.allclose(out_f32, ref, atol=1e-5, rtol=1e-5), "f32 mismatch vs reference"

    # Default bf16 compute path (half the HBM traffic, native MXU rate); loose tol.
    prep_bf16 = prepare_critic_params(params)                 # bf16 default
    out_bf16 = jax.block_until_ready(critic_forward(state, action, prep_bf16))
    assert out_bf16.shape == (batch, agent_count)
    assert jnp.allclose(out_bf16, ref, atol=2e-2, rtol=2e-2), "bf16 mismatch vs reference"

    print("KERNEL_OK")
</pallas_src>

<mosaic_0001>
module attributes {stable_mosaic.version = 11 : i64} {
  func.func @_critic_kernel(%arg0: i32, %arg1: memref<8x32xf32, #tpu.memory_space<vmem>>, %arg2: memref<8x4xf32, #tpu.memory_space<vmem>>, %arg3: memref<32x256xf32, #tpu.memory_space<vmem>>, %arg4: memref<1x256xf32, #tpu.memory_space<vmem>>, %arg5: memref<256x256xf32, #tpu.memory_space<vmem>>, %arg6: memref<4x256xf32, #tpu.memory_space<vmem>>, %arg7: memref<1x256xf32, #tpu.memory_space<vmem>>, %arg8: memref<256x2xf32, #tpu.memory_space<vmem>>, %arg9: memref<1x2xf32, #tpu.memory_space<vmem>>, %arg10: memref<8x2xf32, #tpu.memory_space<vmem>>) attributes {dimension_semantics = [#tpu.dimension_semantics<parallel>], iteration_bounds = array<i64: 1>, scalar_prefetch = 0 : i64, scratch_operands = 0 : i64, tpu.core_type = #tpu.core_type<tc>, window_params = [{transform_indices = @transform_0, window_bounds = array<i64: 8, 32>}, {transform_indices = @transform_1, window_bounds = array<i64: 8, 4>}, {pipeline_mode = #tpu.pipeline_mode<synchronous>, transform_indices = @transform_2, window_bounds = array<i64: 32, 256>}, {pipeline_mode = #tpu.pipeline_mode<synchronous>, transform_indices = @transform_3, window_bounds = array<i64: 1, 256>}, {pipeline_mode = #tpu.pipeline_mode<synchronous>, transform_indices = @transform_4, window_bounds = array<i64: 256, 256>}, {pipeline_mode = #tpu.pipeline_mode<synchronous>, transform_indices = @transform_5, window_bounds = array<i64: 4, 256>}, {pipeline_mode = #tpu.pipeline_mode<synchronous>, transform_indices = @transform_6, window_bounds = array<i64: 1, 256>}, {pipeline_mode = #tpu.pipeline_mode<synchronous>, transform_indices = @transform_7, window_bounds = array<i64: 256, 2>}, {pipeline_mode = #tpu.pipeline_mode<synchronous>, transform_indices = @transform_8, window_bounds = array<i64: 1, 2>}, {transform_indices = @transform_9, window_bounds = array<i64: 8, 2>}]} {
    %c0 = arith.constant 0 : index
    %c0_0 = arith.constant 0 : index
    %0 = vector.load %arg1[%c0, %c0_0] : memref<8x32xf32, #tpu.memory_space<vmem>>, vector<8x32xf32>
    %c0_1 = arith.constant 0 : index
    %c0_2 = arith.constant 0 : index
    %1 = vector.load %arg3[%c0_1, %c0_2] : memref<32x256xf32, #tpu.memory_space<vmem>>, vector<32x256xf32>
    %cst = arith.constant dense<0.000000e+00> : vector<8x256xf32>
    %2 = tpu.matmul %0, %1, %cst {dimension_numbers = #tpu.dot_dimension_numbers<[1], [0], [0], [1], [0, 0, 1, 1], [], []>} : vector<8x32xf32>, vector<32x256xf32>, vector<8x256xf32> -> vector<8x256xf32>
    %c0_3 = arith.constant 0 : index
    %c0_4 = arith.constant 0 : index
    %3 = vector.load %arg4[%c0_3, %c0_4] : memref<1x256xf32, #tpu.memory_space<vmem>>, vector<1x256xf32>
    %4 = vector.broadcast %3 : vector<1x256xf32> to vector<8x256xf32>
    %5 = arith.addf %2, %4 : vector<8x256xf32>
    %cst_5 = arith.constant 0.000000e+00 : f32
    %6 = vector.broadcast %cst_5 : f32 to vector<8x256xf32>
    %7 = arith.maximumf %5, %6 : vector<8x256xf32>
    %c0_6 = arith.constant 0 : index
    %c0_7 = arith.constant 0 : index
    %8 = vector.load %arg5[%c0_6, %c0_7] : memref<256x256xf32, #tpu.memory_space<vmem>>, vector<256x256xf32>
    %cst_8 = arith.constant dense<0.000000e+00> : vector<8x256xf32>
    %9 = tpu.matmul %7, %8, %cst_8 {dimension_numbers = #tpu.dot_dimension_numbers<[1], [0], [0], [1], [0, 0, 1, 1], [], []>} : vector<8x256xf32>, vector<256x256xf32>, vector<8x256xf32> -> vector<8x256xf32>
    %c0_9 = arith.constant 0 : index
    %c0_10 = arith.constant 0 : index
    %10 = vector.load %arg2[%c0_9, %c0_10] : memref<8x4xf32, #tpu.memory_space<vmem>>, vector<8x4xf32>
    %c0_11 = arith.constant 0 : index
    %c0_12 = arith.constant 0 : index
    %11 = vector.load %arg6[%c0_11, %c0_12] : memref<4x256xf32, #tpu.memory_space<vmem>>, vector<4x256xf32>
    %cst_13 = arith.constant dense<0.000000e+00> : vector<8x256xf32>
    %12 = tpu.matmul %10, %11, %cst_13 {dimension_numbers = #tpu.dot_dimension_numbers<[1], [0], [0], [1], [0, 0, 1, 1], [], []>} : vector<8x4xf32>, vector<4x256xf32>, vector<8x256xf32> -> vector<8x256xf32>
    %13 = arith.addf %9, %12 : vector<8x256xf32>
    %c0_14 = arith.constant 0 : index
    %c0_15 = arith.constant 0 : index
    %14 = vector.load %arg7[%c0_14, %c0_15] : memref<1x256xf32, #tpu.memory_space<vmem>>, vector<1x256xf32>
    %15 = vector.broadcast %14 : vector<1x256xf32> to vector<8x256xf32>
    %16 = arith.addf %13, %15 : vector<8x256xf32>
    %cst_16 = arith.constant 0.000000e+00 : f32
    %17 = vector.broadcast %cst_16 : f32 to vector<8x256xf32>
    %18 = arith.maximumf %16, %17 : vector<8x256xf32>
    %c0_17 = arith.constant 0 : index
    %c0_18 = arith.constant 0 : index
    %19 = vector.load %arg8[%c0_17, %c0_18] : memref<256x2xf32, #tpu.memory_space<vmem>>, vector<256x2xf32>
    %cst_19 = arith.constant dense<0.000000e+00> : vector<8x2xf32>
    %20 = tpu.matmul %18, %19, %cst_19 {dimension_numbers = #tpu.dot_dimension_numbers<[1], [0], [0], [1], [0, 0, 1, 1], [], []>} : vector<8x256xf32>, vector<256x2xf32>, vector<8x2xf32> -> vector<8x2xf32>
    %c0_20 = arith.constant 0 : index
    %c0_21 = arith.constant 0 : index
    %21 = vector.load %arg9[%c0_20, %c0_21] : memref<1x2xf32, #tpu.memory_space<vmem>>, vector<1x2xf32>
    %22 = vector.broadcast %21 : vector<1x2xf32> to vector<8x2xf32>
    %23 = arith.addf %20, %22 : vector<8x2xf32>
    %c0_22 = arith.constant 0 : index
    %c0_23 = arith.constant 0 : index
    %24 = vector.load %arg10[%c0_22, %c0_23] : memref<8x2xf32, #tpu.memory_space<vmem>>, vector<8x2xf32>
    tpu.vector_store %arg10[%c0_22, %c0_23], %23 {strides = array<i32>} : memref<8x2xf32, #tpu.memory_space<vmem>>, vector<8x2xf32>,
    return
  }
  func.func @transform_0(%arg0: i32) -> (i32, i32) {
    %c0_i32 = arith.constant 0 : i32
    %c0_i32_0 = arith.constant 0 : i32
    return %arg0, %c0_i32 : i32, i32
  }
  func.func @transform_1(%arg0: i32) -> (i32, i32) {
    %c0_i32 = arith.constant 0 : i32
    %c0_i32_0 = arith.constant 0 : i32
    return %arg0, %c0_i32 : i32, i32
  }
  func.func @transform_2(%arg0: i32) -> (i32, i32) {
    %c0_i32 = arith.constant 0 : i32
    %c0_i32_0 = arith.constant 0 : i32
    %c0_i32_1 = arith.constant 0 : i32
    return %c0_i32, %c0_i32_0 : i32, i32
  }
  func.func @transform_3(%arg0: i32) -> (i32, i32) {
    %c0_i32 = arith.constant 0 : i32
    %c0_i32_0 = arith.constant 0 : i32
    %c0_i32_1 = arith.constant 0 : i32
    return %c0_i32, %c0_i32_0 : i32, i32
  }
  func.func @transform_4(%arg0: i32) -> (i32, i32) {
    %c0_i32 = arith.constant 0 : i32
    %c0_i32_0 = arith.constant 0 : i32
    %c0_i32_1 = arith.constant 0 : i32
    return %c0_i32, %c0_i32_0 : i32, i32
  }
  func.func @transform_5(%arg0: i32) -> (i32, i32) {
    %c0_i32 = arith.constant 0 : i32
    %c0_i32_0 = arith.constant 0 : i32
    %c0_i32_1 = arith.constant 0 : i32
    return %c0_i32, %c0_i32_0 : i32, i32
  }
  func.func @transform_6(%arg0: i32) -> (i32, i32) {
    %c0_i32 = arith.constant 0 : i32
    %c0_i32_0 = arith.constant 0 : i32
    %c0_i32_1 = arith.constant 0 : i32
    return %c0_i32, %c0_i32_0 : i32, i32
  }
  func.func @transform_7(%arg0: i32) -> (i32, i32) {
    %c0_i32 = arith.constant 0 : i32
    %c0_i32_0 = arith.constant 0 : i32
    %c0_i32_1 = arith.constant 0 : i32
    return %c0_i32, %c0_i32_0 : i32, i32
  }
  func.func @transform_8(%arg0: i32) -> (i32, i32) {
    %c0_i32 = arith.constant 0 : i32
    %c0_i32_0 = arith.constant 0 : i32
    %c0_i32_1 = arith.constant 0 : i32
    return %c0_i32, %c0_i32_0 : i32, i32
  }
  func.func @transform_9(%arg0: i32) -> (i32, i32) {
    %c0_i32 = arith.constant 0 : i32
    %c0_i32_0 = arith.constant 0 : i32
    return %arg0, %c0_i32 : i32, i32
  }
}

</mosaic_0001>

<bundles_post_ra>
// kernel: tpu_custom_call.1
= control target key start
LH: loop header
LB: loop body
LE: loop exit
PB: predicated region body
PF: predicated region fallthrough
CT: control target
= control target key end

     0   :  { %14 = vsyncpa [#allocation3], 0  ;;  %s562_s30 = smov [#allocation2]   ;;  %s760_s0 = inlined_call_operand.vmem [shape: f32[8,32], index: 0, kind: input, shape index: {}]   ;;  %s761_s1 = inlined_call_operand.vmem [shape: f32[8,4], index: 1, kind: input, shape index: {}]   ;;  %s762_s2 = inlined_call_operand.vmem [shape: f32[32,256], index: 2, kind: input, shape index: {}]   ;;  %s763_s3 = inlined_call_operand.vmem [shape: f32[1,256], index: 3, kind: input, shape index: {}]   ;;  %s764_s4 = inlined_call_operand.hbm [shape: f32[256,256], index: 4, kind: input, shape index: {}]   ;;  %s765_s5 = inlined_call_operand.vmem [shape: f32[4,256], index: 5, kind: input, shape index: {}]   ;;  %s766_s6 = inlined_call_operand.vmem [shape: f32[1,256], index: 6, kind: input, shape index: {}]   ;;  %s767_s7 = inlined_call_operand.vmem [shape: f32[256,2], index: 7, kind: input, shape index: {}]   ;;  %s768_s8 = inlined_call_operand.vmem [shape: f32[1,2], index: 8, kind: input, shape index: {}]   ;;  %s769_s9 = inlined_call_operand.vmem [shape: f32[8,2], index: 9, kind: output, shape index: {}]  }
   0x1   :  { %s28_s10 = sshll.u32 %s562_s30, 4  ;;  %s29_s10 = int_to_ptr.vmem [resolvable:$true] %s28_s10 }
   0x2   :  { %s548_s11 = scalar_lea.vmem %s29_s10, 8192  ;;  %p553_p1 = scmp.lt.s32.totalorder %s29_s10, %s29_s10 }
   0x3   :  { %p549_p0 = scmp.ne.s32.totalorder %s29_s10, %s548_s11  ;;  %p554_p2 = scmp.lt.s32.totalorder %s548_s11, %s548_s11 }
   0x5   :  { %p555_p3 = por %p554_p2, %p553_p1 }
   0x7   :  { %p556_p4 = pnand %p555_p3, %p549_p0 }
   0x9   :  { %559 = shalt.err (!%p556_p4)
}
   0xa   :  { %s563_s12 = smov 256   ;;  %s564_s13 = smov 16  }
   0xb   :  { %34 = dma.hbm_to_vmem [thread:$0]  %s764_s4, 8192, %s29_s10, [#allocation3], %s563_s12, %s563_s12, %s564_s13  }
   0xc   :  { %560 = dma.done.wait [#allocation3], 8192  }
   0xd   :  { %561 = vsyncadd [#allocation3], 4294959104  ;;  %v565_v0 = vmov 0.0   ;;  %v54_v1 = vld [vmem:[%s762_s2 + $0x38] sm:$0xff]  ;;  %v53_v2 = vld [vmem:[%s762_s2 + $0x30] sm:$0xff]  ;;  %vm67_vm0 = vcmask 261120  }
   0xe   :  { %135 = vmatprep.mubr.f32.mxu0 %v565_v0  ;;  %v52_v3 = vld [vmem:[%s762_s2 + $0x28] sm:$0xff]  ;;  %95 = vmatprep.subr.mxu0 %v54_v1  ;;  %v51_v4 = vld [vmem:[%s762_s2 + $0x20] sm:$0xff]  ;;  %v50_v5 = vld [vmem:[%s762_s2 + $0x18] sm:$0xff]  ;;  %vm216_vm1 = vcmask 1043456   ;;  %vm212_vm2 = vcmask 31744   ;;  %vm488_vm3 = vcmask 15360  }
   0xf   :  { %96 = vmatpush1.msra.mxu0 %v53_v2  ;;  %v49_v6 = vld [vmem:[%s762_s2 + $0x10] sm:$0xff]  ;;  %v175_v7 = vld [vmem:[#allocation2 + $0xf8] sm:$0xff]  ;;  %v173_v9 = vld [vmem:[#allocation2 + $0xe8] sm:$0xff] }
  0x10   :  { %97 = vmatprep.subr.mxu0 %v52_v3  ;;  %v174_v8 = vld [vmem:[#allocation2 + $0xf0] sm:$0xff]  ;;  %v48_v10 = vld [vmem:[%s762_s2 + $0x8] sm:$0xff]  ;;  %292 = vmatprep.subr.mxu1 %v175_v7  ;;  %v172_v11 = vld [vmem:[#allocation2 + $0xe0] sm:$0xff] }
  0x11   :  { %98 = vmatpush1.msra.mxu0 %v51_v4  ;;  %v47_v12 = vld [vmem:[%s762_s2] sm:$0xff]  ;;  %293 = vmatpush1.msra.mxu1 %v174_v8  ;;  %v171_v13 = vld [vmem:[#allocation2 + $0xd8] sm:$0xff]  ;;  %v170_v15 = vld [vmem:[#allocation2 + $0xd0] sm:$0xff] }
  0x12   :  { %99 = vmatprep.subr.mxu0 %v50_v5  ;;  %v46_v14 = vld [vmem:[%s760_s0] sm:$0xff]  ;;  %294 = vmatprep.subr.mxu1 %v173_v9  ;;  %v169_v16 = vld [vmem:[#allocation2 + $0xc8] sm:$0xff]  ;;  %v167_v18 = vld [vmem:[#allocation2 + $0xb8] sm:$0xff] }
  0x13   :  { %100 = vmatpush1.msra.mxu0 %v49_v6  ;;  %295 = vmatpush1.msra.mxu1 %v172_v11  ;;  %v168_v17 = vld [vmem:[#allocation2 + $0xc0] sm:$0xff]  ;;  %v166_v19 = vld [vmem:[#allocation2 + $0xb0] sm:$0xff]  ;;  %v165_v20 = vld [vmem:[#allocation2 + $0xa8] sm:$0xff] }
  0x14   :  { %101 = vmatprep.subr.mxu0 %v48_v10  ;;  %296 = vmatprep.subr.mxu1 %v171_v13  ;;  %v164_v21 = vld [vmem:[#allocation2 + $0xa0] sm:$0xff]  ;;  %v163_v22 = vld [vmem:[#allocation2 + $0x98] sm:$0xff]  ;;  %v162_v23 = vld [vmem:[#allocation2 + $0x90] sm:$0xff] }
  0x15   :  { %102 = vmatpush1.msra.mxu0 %v47_v12  ;;  %297 = vmatpush1.msra.mxu1 %v170_v15  ;;  %v161_v24 = vld [vmem:[#allocation2 + $0x88] sm:$0xff]  ;;  %v160_v25 = vld [vmem:[#allocation2 + $0x80] sm:$0xff]  ;;  %v159_v26 = vld [vmem:[#allocation2 + $0x78] sm:$0xff] }
  0x16   :  { %495 = vmatmul.mubr.msk.f32.vlgmr.msra.gmra.mxu0 %vm67_vm0, %v46_v14  ;;  %298 = vmatprep.subr.mxu1 %v169_v16  ;;  %v158_v27 = vld [vmem:[#allocation2 + $0x70] sm:$0xff]  ;;  %v157_v28 = vld [vmem:[#allocation2 + $0x68] sm:$0xff]  ;;  %v156_v29 = vld [vmem:[#allocation2 + $0x60] sm:$0xff] }
  0x17   :  { %285 = vmatprep.mubr.f32.mxu0 %v565_v0  ;;  %299 = vmatpush1.msra.mxu1 %v168_v17  ;;  %v155_v30 = vld [vmem:[#allocation2 + $0x58] sm:$0xff]  ;;  %v154_v31 = vld [vmem:[#allocation2 + $0x50] sm:$0xff]  ;;  %v153_v32 = vld [vmem:[#allocation2 + $0x48] sm:$0xff] }
  0x18   :  { %300 = vmatprep.subr.mxu1 %v167_v18  ;;  %v152_v33 = vld [vmem:[#allocation2 + $0x40] sm:$0xff]  ;;  %v151_v34 = vld [vmem:[#allocation2 + $0x38] sm:$0xff]  ;;  %v150_v35 = vld [vmem:[#allocation2 + $0x30] sm:$0xff] }
  0x19   :  { %301 = vmatpush1.msra.mxu1 %v166_v19  ;;  %v149_v36 = vld [vmem:[#allocation2 + $0x28] sm:$0xff]  ;;  %v148_v37 = vld [vmem:[#allocation2 + $0x20] sm:$0xff]  ;;  %v147_v38 = vld [vmem:[#allocation2 + $0x18] sm:$0xff] }
  0x1a   :  { %302 = vmatprep.subr.mxu1 %v165_v20  ;;  %v146_v39 = vld [vmem:[#allocation2 + $0x10] sm:$0xff]  ;;  %v145_v40 = vld [vmem:[#allocation2 + $0x8] sm:$0xff]  ;;  %v144_v41 = vld [vmem:[#allocation2] sm:$0xff] }
  0x1b   :  { %303 = vmatpush1.msra.mxu1 %v164_v21  ;;  %v207_v42 = vld [vmem:[#allocation2 + $0x1f8] sm:$0xff]  ;;  %v206_v43 = vld [vmem:[#allocation2 + $0x1f0] sm:$0xff]  ;;  %v205_v44 = vld [vmem:[#allocation2 + $0x1e8] sm:$0xff] }
  0x1c   :  { %304 = vmatprep.subr.mxu1 %v163_v22  ;;  %v204_v45 = vld [vmem:[#allocation2 + $0x1e0] sm:$0xff]  ;;  %v203_v46 = vld [vmem:[#allocation2 + $0x1d8] sm:$0xff]  ;;  %v202_v47 = vld [vmem:[#allocation2 + $0x1d0] sm:$0xff] }
  0x1d   :  { %305 = vmatpush1.msra.mxu1 %v162_v23  ;;  %v201_v48 = vld [vmem:[#allocation2 + $0x1c8] sm:$0xff]  ;;  %v200_v49 = vld [vmem:[#allocation2 + $0x1c0] sm:$0xff]  ;;  %v199_v50 = vld [vmem:[#allocation2 + $0x1b8] sm:$0xff] }
  0x1e   :  { %306 = vmatprep.subr.mxu1 %v161_v24  ;;  %v198_v51 = vld [vmem:[#allocation2 + $0x1b0] sm:$0xff]  ;;  %v197_v52 = vld [vmem:[#allocation2 + $0x1a8] sm:$0xff]  ;;  %v196_v53 = vld [vmem:[#allocation2 + $0x1a0] sm:$0xff] }
  0x1f   :  { %307 = vmatpush1.msra.mxu1 %v160_v25  ;;  %v195_v54 = vld [vmem:[#allocation2 + $0x198] sm:$0xff]  ;;  %v194_v55 = vld [vmem:[#allocation2 + $0x190] sm:$0xff]  ;;  %v193_v56 = vld [vmem:[#allocation2 + $0x188] sm:$0xff] }
  0x20   :  { %308 = vmatprep.subr.mxu1 %v159_v26  ;;  %v192_v57 = vld [vmem:[#allocation2 + $0x180] sm:$0xff]  ;;  %v191_v58 = vld [vmem:[#allocation2 + $0x178] sm:$0xff]  ;;  %v190_v59 = vld [vmem:[#allocation2 + $0x170] sm:$0xff] }
  0x21   :  { %309 = vmatpush1.msra.mxu1 %v158_v27  ;;  %v189_v60 = vld [vmem:[#allocation2 + $0x168] sm:$0xff]  ;;  %v188_v61 = vld [vmem:[#allocation2 + $0x160] sm:$0xff]  ;;  %v187_v62 = vld [vmem:[#allocation2 + $0x158] sm:$0xff] }
  0x22   :  { %310 = vmatprep.subr.mxu1 %v157_v28  ;;  %v186_v63 = vld [vmem:[#allocation2 + $0x150] sm:$0xff]  ;;  %v185_v0 = vld [vmem:[#allocation2 + $0x148] sm:$0xff]  ;;  %v184_v1 = vld [vmem:[#allocation2 + $0x140] sm:$0xff] }
  0x23   :  { %311 = vmatpush1.msra.mxu1 %v156_v29  ;;  %v183_v2 = vld [vmem:[#allocation2 + $0x138] sm:$0xff]  ;;  %v182_v3 = vld [vmem:[#allocation2 + $0x130] sm:$0xff]  ;;  %v181_v4 = vld [vmem:[#allocation2 + $0x128] sm:$0xff] }
  0x24   :  { %312 = vmatprep.subr.mxu1 %v155_v30  ;;  %v209_v5 = vld [vmem:[%s765_s5] sm:$0xff]  ;;  %v179_v8 = vld [vmem:[#allocation2 + $0x118] sm:$0xff]  ;;  %v178_v9 = vld [vmem:[#allocation2 + $0x110] sm:$0xff] }
  0x25   :  { %313 = vmatpush1.msra.mxu1 %v154_v31  ;;  %v211_v6 = vcombine.high %v209_v5, %v209_v5  ;;  %v180_v7 = vld [vmem:[#allocation2 + $0x120] sm:$0xff]  ;;  %v177_v11 = vld [vmem:[#allocation2 + $0x108] sm:$0xff]  ;;  %v410_v13 = vld [vmem:[%s767_s7 + $0xf8] sm:$0xff] }
  0x26   :  { %314 = vmatprep.subr.mxu1 %v153_v32  ;;  %v208_v10 = vld [vmem:[%s761_s1] sm:$0xff]  ;;  %v394_v14 = vld [vmem:[%s767_s7 + $0x78] sm:$0xff]  ;;  %v409_v15 = vld [vmem:[%s767_s7 + $0xf0] sm:$0xff] }
  0x27   :  { %315 = vmatpush1.msra.mxu1 %v152_v33  ;;  %496 = vmatprep.subr.msk.mxu0 %vm216_vm1, %v211_v6  ;;  %v176_v12 = vld [vmem:[#allocation2 + $0x100] sm:$0xff]  ;;  %v393_v16 = vld [vmem:[%s767_s7 + $0x70] sm:$0xff]  ;;  %v408_v17 = vld [vmem:[%s767_s7 + $0xe8] sm:$0xff] }
  0x28   :  { %316 = vmatprep.subr.mxu1 %v151_v34  ;;  %497 = vmatpush1.msk.msra.mxu0 %vm216_vm1, %v209_v5  ;;  %v392_v18 = vld [vmem:[%s767_s7 + $0x68] sm:$0xff]  ;;  %v407_v19 = vld [vmem:[%s767_s7 + $0xe0] sm:$0xff]  ;;  %v406_v21 = vld [vmem:[%s767_s7 + $0xd8] sm:$0xff] }
  0x29   :  { %317 = vmatpush1.msra.mxu1 %v150_v35  ;;  %498 = vmatmul.mubr.msk.f32.vlgmr.msra.gmra.mxu0 %vm212_vm2, %v208_v10  ;;  %v391_v20 = vld [vmem:[%s767_s7 + $0x60] sm:$0xff]  ;;  %v390_v22 = vld [vmem:[%s767_s7 + $0x58] sm:$0xff]  ;;  %v405_v23 = vld [vmem:[%s767_s7 + $0xd0] sm:$0xff]  ;;  %v57_v35 = vlaneseq }
  0x2a   :  { %318 = vmatprep.subr.mxu1 %v149_v36  ;;  %500 = vmatprep.subr.mxu0 %v410_v13  ;;  %v389_v24 = vld [vmem:[%s767_s7 + $0x50] sm:$0xff]  ;;  %v404_v25 = vld [vmem:[%s767_s7 + $0xc8] sm:$0xff]  ;;  %v403_v27 = vld [vmem:[%s767_s7 + $0xc0] sm:$0xff] }
  0x2b   :  { %319 = vmatpush1.msra.mxu1 %v148_v37  ;;  %501 = vmatpush3.msra.mxu0 %v394_v14  ;;  %v388_v26 = vld [vmem:[%s767_s7 + $0x48] sm:$0xff]  ;;  %v387_v28 = vld [vmem:[%s767_s7 + $0x40] sm:$0xff]  ;;  %v402_v29 = vld [vmem:[%s767_s7 + $0xb8] sm:$0xff]  ;;  %v58_v36 = vshrl.u32 %v57_v35, 7 }
  0x2c   :  { %320 = vmatprep.subr.mxu1 %v147_v38  ;;  %502 = vmatprep.subr.mxu0 %v409_v15  ;;  %v386_v30 = vld [vmem:[%s767_s7 + $0x38] sm:$0xff]  ;;  %v401_v31 = vld [vmem:[%s767_s7 + $0xb0] sm:$0xff]  ;;  %v400_v33 = vld [vmem:[%s767_s7 + $0xa8] sm:$0xff] }
  0x2d   :  { %321 = vmatpush1.msra.mxu1 %v146_v39  ;;  %503 = vmatpush3.msra.mxu0 %v393_v16  ;;  %v385_v32 = vld [vmem:[%s767_s7 + $0x30] sm:$0xff]  ;;  %v384_v34 = vld [vmem:[%s767_s7 + $0x28] sm:$0xff]  ;;  %v59_v37 = vsub.s32 0, %v58_v36  ;;  %v55_v38 = vld [vmem:[%s763_s3] sm:$0x3]  ;;  %v63_v39 = vsub.s32 1, %v58_v36 }
  0x2e   :  { %322 = vmatprep.subr.mxu1 %v145_v40  ;;  %504 = vmatprep.subr.mxu0 %v408_v17 }
  0x2f   :  { %323 = vmatpush1.msra.mxu1 %v144_v41  ;;  %505 = vmatpush3.msra.mxu0 %v392_v18  ;;  %v60_v40 = vrot.slane %v55_v38, %v59_v37  ;;  %v64_v41 = vrot.slane %v55_v38, %v63_v39 }
  0x30   :  { %324 = vmatprep.subr.mxu1 %v207_v42  ;;  %506 = vmatprep.subr.mxu0 %v407_v19 }
  0x31   :  { %325 = vmatpush2.msra.mxu1 %v206_v43  ;;  %507 = vmatpush3.msra.mxu0 %v391_v20 }
  0x32   :  { %326 = vmatprep.subr.mxu1 %v205_v44  ;;  %508 = vmatprep.subr.mxu0 %v406_v21 }
  0x33   :  { %327 = vmatpush2.msra.mxu1 %v204_v45  ;;  %509 = vmatpush3.msra.mxu0 %v390_v22 }
  0x34   :  { %328 = vmatprep.subr.mxu1 %v203_v46  ;;  %510 = vmatprep.subr.mxu0 %v405_v23 }
  0x35   :  { %329 = vmatpush2.msra.mxu1 %v202_v47  ;;  %511 = vmatpush3.msra.mxu0 %v389_v24 }
  0x36   :  { %330 = vmatprep.subr.mxu1 %v201_v48  ;;  %512 = vmatprep.subr.mxu0 %v404_v25  ;;  %v399_v48 = vld [vmem:[%s767_s7 + $0xa0] sm:$0xff] }
  0x37   :  { %331 = vmatpush2.msra.mxu1 %v200_v49  ;;  %513 = vmatpush3.msra.mxu0 %v388_v26  ;;  %v383_v49 = vld [vmem:[%s767_s7 + $0x20] sm:$0xff] }
  0x38   :  { %332 = vmatprep.subr.mxu1 %v199_v50  ;;  %514 = vmatprep.subr.mxu0 %v403_v27  ;;  %v398_v50 = vld [vmem:[%s767_s7 + $0x98] sm:$0xff] }
  0x39   :  { %333 = vmatpush2.msra.mxu1 %v198_v51  ;;  %515 = vmatpush3.msra.mxu0 %v387_v28  ;;  %v382_v51 = vld [vmem:[%s767_s7 + $0x18] sm:$0xff] }
  0x3a   :  { %334 = vmatprep.subr.mxu1 %v197_v52  ;;  %516 = vmatprep.subr.mxu0 %v402_v29  ;;  %v397_v52 = vld [vmem:[%s767_s7 + $0x90] sm:$0xff] }
  0x3b   :  { %335 = vmatpush2.msra.mxu1 %v196_v53  ;;  %517 = vmatpush3.msra.mxu0 %v386_v30  ;;  %v381_v53 = vld [vmem:[%s767_s7 + $0x10] sm:$0xff] }
  0x3c   :  { %336 = vmatprep.subr.mxu1 %v195_v54  ;;  %518 = vmatprep.subr.mxu0 %v401_v31  ;;  %v396_v54 = vld [vmem:[%s767_s7 + $0x88] sm:$0xff] }
  0x3d   :  { %337 = vmatpush2.msra.mxu1 %v194_v55  ;;  %519 = vmatpush3.msra.mxu0 %v385_v32  ;;  %v380_v55 = vld [vmem:[%s767_s7 + $0x8] sm:$0xff] }
  0x3e   :  { %338 = vmatprep.subr.mxu1 %v193_v56  ;;  %520 = vmatprep.subr.mxu0 %v400_v33  ;;  %v395_v56 = vld [vmem:[%s767_s7 + $0x80] sm:$0xff] }
  0x3f   :  { %339 = vmatpush2.msra.mxu1 %v192_v57  ;;  %521 = vmatpush3.msra.mxu0 %v384_v34  ;;  %v379_v57 = vld [vmem:[%s767_s7] sm:$0xff] }
  0x40   :  { %340 = vmatprep.subr.mxu1 %v191_v58  ;;  %522 = vmatprep.subr.mxu0 %v399_v48  ;;  %v363_v58 = vld [vmem:[%s766_s6] sm:$0x3] }
  0x41   :  { %341 = vmatpush2.msra.mxu1 %v190_v59  ;;  %523 = vmatpush3.msra.mxu0 %v383_v49 }
  0x42   :  { %342 = vmatprep.subr.mxu1 %v189_v60  ;;  %524 = vmatprep.subr.mxu0 %v398_v50 }
  0x43   :  { %343 = vmatpush2.msra.mxu1 %v188_v61  ;;  %525 = vmatpush3.msra.mxu0 %v382_v51  ;;  %v368_v61 = vrot.slane %v363_v58, %v59_v37 }
  0x44   :  { %344 = vmatprep.subr.mxu1 %v187_v62  ;;  %526 = vmatprep.subr.mxu0 %v397_v52 }
  0x45   :  { %345 = vmatpush2.msra.mxu1 %v186_v63  ;;  %527 = vmatpush3.msra.mxu0 %v381_v53  ;;  %v372_v63 = vrot.slane %v363_v58, %v63_v39 }
  0x46   :  { %346 = vmatprep.subr.mxu1 %v185_v0  ;;  %528 = vmatprep.subr.mxu0 %v396_v54 }
  0x47   :  { %347 = vmatpush2.msra.mxu1 %v184_v1  ;;  %529 = vmatpush3.msra.mxu0 %v380_v55 }
  0x48   :  { %348 = vmatprep.subr.mxu1 %v183_v2  ;;  %530 = vmatprep.subr.mxu0 %v395_v56 }
  0x49   :  { %349 = vmatpush2.msra.mxu1 %v182_v3  ;;  %531 = vmatpush3.msra.mxu0 %v379_v57 }
  0x4a   :  { %350 = vmatprep.subr.mxu1 %v181_v4 }
  0x4b   :  { %351 = vmatpush2.msra.mxu1 %v180_v7 }
  0x4c   :  { %352 = vmatprep.subr.mxu1 %v179_v8  ;;  %v499_v8 = vld [vmem:[%s768_s8] ss:$0 sm:$0xff] }
  0x4d   :  { %353 = vmatpush2.msra.mxu1 %v178_v9 }
  0x4e   :  { %354 = vmatprep.subr.mxu1 %v177_v11 }
  0x4f   :  { %355 = vmatpush2.msra.mxu1 %v176_v12 }
  0xd6   :  { %v137_v42 = vpop.f32.mrf.mxu0 }
  0xd7   :  { %v138_v43 = vadd.f32 %v137_v42, %v60_v40 }
  0xd8   :  { %v139_v44 = vpop.f32.mrf.mxu0 }
  0xd9   :  { %v140_v45 = vadd.f32 %v139_v44, %v64_v41  ;;  %v142_v47 = vmax.f32 %v138_v43, 0.0 }
  0xdb   :  { %v143_v46 = vmax.f32 %v140_v45, 0.0 }
  0xdd   :  { %356 = vmatprep.mubr.f32.mxu1 %v143_v46 }
  0xde   :  { %357 = vmatmul.mubr.f32.vlgmr.msra.gmra.mxu1 %v142_v47 }
  0xe9   :  { %v287_v59 = vpop.f32.mrf.mxu0 }
  0xeb   :  { %v289_v0 = vpop.f32.mrf.mxu0 }
 0x19e   :  { %v358_v60 = vpop.f32.mrf.mxu1 }
 0x19f   :  { %v359_v62 = vadd.f32 %v358_v60, %v287_v59 }
 0x1a0   :  { %v360_v1 = vpop.f32.mrf.mxu1 }
 0x1a1   :  { %v361_v2 = vadd.f32 %v360_v1, %v289_v0  ;;  %v375_v3 = vadd.f32 %v368_v61, %v359_v62 }
 0x1a3   :  { %v376_v4 = vadd.f32 %v372_v63, %v361_v2  ;;  %v377_v6 = vmax.f32 %v375_v3, 0.0 }
 0x1a5   :  { %v378_v5 = vmax.f32 %v376_v4, 0.0 }
 0x1a7   :  { %482 = vmatprep.mubr.f32.mxu0 %v378_v5 }
 0x1a8   :  { %483 = vmatmul.mubr.f32.vlgmr.msra.gmra.mxu0 %v377_v6 }
 0x268   :  { %v532_v7 = vpop.f32.mrf.mxu0 }
 0x26a   :  { %v533_v9 = vpop.f32.mrf.mxu0 }
 0x26b   :  { %v534_v10 = vadd.f32 %v533_v9, %v532_v7 }
 0x26d   :  { %v485_v11 = vadd.f32 %v534_v10, %v499_v8 }
 0x26f   :  { %489 = vst.msk [vmem:[%s769_s9] sm:$0xff] %vm488_vm3, %v485_v11 }
 0x270   :  { %494 = vsyncpa [#allocation3], 1 }

</bundles_post_ra>
